<compile_context>
chip_gen: v6e
topology: v6e:2x2x1
jax: 0.10.0
libtpu: 0.0.40
codegen_flags: <defaults>
</compile_context>

<pallas_src>
import jax
import jax.numpy as jnp
import numpy as np
from jax.experimental import pallas as pl
from jax.experimental.pallas import tpu as pltpu

NEG_SLOPE = 0.1  # nn.LeakyReLU(0.1) in the original module


def _leaky(h):
    return jnp.where(h >= 0, h, NEG_SLOPE * h)


def _cdiv(a, b):
    return -(-a // b)


def _round_up(x, m):
    return _cdiv(x, m) * m


def _make_kernel(P, need_mask):
    """Kernel over one (img_tile, TP, K_pad) block of im2col rows."""

    def kernel(patch_ref, w1_ref, b1_ref, w2_ref, b2_ref, w3_ref, b3_ref,
               w4_ref, b4_ref, w5_ref, b5_ref, out_ref):
        pi = pl.program_id(1)
        imgs, tp, kpad = patch_ref.shape

        x = patch_ref[...].reshape(imgs * tp, kpad)                 # bf16 rows

        # Conv2d(3,128,4,stride=4) as im2col matmul + LeakyReLU (f32 accum).
        h = _leaky(jnp.dot(x, w1_ref[...],
                           preferred_element_type=jnp.float32) + b1_ref[...])
        # Three Conv2d(128,128,1) + LeakyReLU (1x1 conv == per-row matmul).
        h = _leaky(jnp.dot(h.astype(jnp.bfloat16), w2_ref[...],
                           preferred_element_type=jnp.float32) + b2_ref[...])
        h = _leaky(jnp.dot(h.astype(jnp.bfloat16), w3_ref[...],
                           preferred_element_type=jnp.float32) + b3_ref[...])
        h = _leaky(jnp.dot(h.astype(jnp.bfloat16), w4_ref[...],
                           preferred_element_type=jnp.float32) + b4_ref[...])
        # Conv2d(128,32,1) (no activation).
        feat = (jnp.dot(h.astype(jnp.bfloat16), w5_ref[...],
                        preferred_element_type=jnp.float32) + b5_ref[...])

        feat = feat.reshape(imgs, tp, feat.shape[-1])               # (imgs,TP,32)
        if need_mask:
            # Zero out padded pixel rows so they don't pollute the pooled sum
            # (bias + LeakyReLU make zero-padded rows non-zero after conv).
            pix = pi * tp + jax.lax.broadcasted_iota(jnp.int32, feat.shape, 1)
            feat = jnp.where(pix < P, feat, 0.0)

        part = jnp.sum(feat, axis=1, keepdims=True)                 # (imgs,1,32) f32

        @pl.when(pi == 0)
        def _():
            out_ref[...] = jnp.zeros_like(out_ref)

        out_ref[...] += part                                        # running per-image sum

    return kernel


def estimator_forward(x, params, *, tm_target=512):
    """x: NCHW float32, H and W divisible by 4.  Returns (B, 4)."""
    x = jnp.asarray(x, jnp.float32)
    B, C, H, W = x.shape
    Hp, Wp = H // 4, W // 4
    P = Hp * Wp
    K = C * 16

    # im2col: (B,C,H,W) -> (B, P, K) with feature order (c, kh, kw).
    patches = (x.reshape(B, C, Hp, 4, Wp, 4)
                 .transpose(0, 2, 4, 1, 3, 5)
                 .reshape(B, P, K))

    # ---- tiling choices --------------------------------------------------
    K_pad = _round_up(K, 64)                         # lane-friendly contraction dim
    TP = min(_round_up(P, 16), _round_up(tm_target, 16))
    n_p_tiles = _cdiv(P, TP)
    P_pad = n_p_tiles * TP
    if n_p_tiles == 1:
        img_tile = max(1, min(tm_target // TP, B))   # fuse batch into M rows
    else:
        img_tile = 1                                 # big images: tile pixels instead
    n_b_tiles = _cdiv(B, img_tile)
    B_pad = n_b_tiles * img_tile

    patches = jnp.pad(patches,
                      ((0, B_pad - B), (0, P_pad - P), (0, K_pad - K)))
    patches = patches.astype(jnp.bfloat16)

    # Weights in (in, out) matmul form, bf16 for the MXU; biases stay f32.
    w1 = jnp.pad(params["w1"].reshape(128, K).T,
                 ((0, K_pad - K), (0, 0))).astype(jnp.bfloat16)      # (K_pad,128)
    w2 = params["w2"][:, :, 0, 0].T.astype(jnp.bfloat16)             # (128,128)
    w3 = params["w3"][:, :, 0, 0].T.astype(jnp.bfloat16)
    w4 = params["w4"][:, :, 0, 0].T.astype(jnp.bfloat16)
    w5 = params["w5"][:, :, 0, 0].T.astype(jnp.bfloat16)             # (128,32)
    b1 = params["b1"][None].astype(jnp.float32)                      # (1,128)
    b2 = params["b2"][None].astype(jnp.float32)
    b3 = params["b3"][None].astype(jnp.float32)
    b4 = params["b4"][None].astype(jnp.float32)
    b5 = params["b5"][None].astype(jnp.float32)                      # (1,32)

    def whole(arr):
        shp = arr.shape
        # Constant block index across the whole grid -> weights stay VMEM
        # resident; Pallas does not re-DMA an unchanged block.
        return pl.BlockSpec(shp, lambda bi, pi, _s=shp: (0,) * len(_s))

    kernel = _make_kernel(P, need_mask=(P_pad != P))

    sums = pl.pallas_call(
        kernel,
        out_shape=jax.ShapeDtypeStruct((B_pad, 1, 32), jnp.float32),
        grid_spec=pltpu.PrefetchScalarGridSpec(
            num_scalar_prefetch=0,
            grid=(n_b_tiles, n_p_tiles),                 # reduction axis last
            in_specs=[
                pl.BlockSpec((img_tile, TP, K_pad), lambda bi, pi: (bi, pi, 0)),
                whole(w1), whole(b1),
                whole(w2), whole(b2),
                whole(w3), whole(b3),
                whole(w4), whole(b4),
                whole(w5), whole(b5),
            ],
            out_specs=pl.BlockSpec((img_tile, 1, 32), lambda bi, pi: (bi, 0, 0)),
        ),
        compiler_params=pltpu.CompilerParams(
            dimension_semantics=("parallel", "arbitrary")),
    )(patches, w1, b1, w2, b2, w3, b3, w4, b4, w5, b5)

    pooled = sums[:B, 0, :] / jnp.float32(P)     # AvgPool2d over full spatial extent
    # Linear(32 -> 4) hoisted to plain JAX (tiny GEMV, f32 params).
    return pooled @ params["wl"].T + params["bl"][None]


def reference_forward(x, params):
    """Pure-JAX f32 reference mirroring the PyTorch module."""
    dn = ("NCHW", "OIHW", "NCHW")
    h = jax.lax.conv_general_dilated(x, params["w1"], (4, 4), "VALID",
                                     dimension_numbers=dn)
    h = _leaky(h + params["b1"][None, :, None, None])
    for i in (2, 3, 4):
        h = jax.lax.conv_general_dilated(h, params[f"w{i}"], (1, 1), "VALID",
                                         dimension_numbers=dn)
        h = _leaky(h + params[f"b{i}"][None, :, None, None])
    h = jax.lax.conv_general_dilated(h, params["w5"], (1, 1), "VALID",
                                     dimension_numbers=dn)
    h = h + params["b5"][None, :, None, None]
    pooled = jnp.mean(h, axis=(2, 3))            # AvgPool2d over full spatial + view
    return pooled @ params["wl"].T + params["bl"][None]


def init_params(key):
    """Deterministic synthetic parameters matching the PyTorch __init__ shapes."""
    ks = jax.random.split(key, 12)
    f32 = jnp.float32
    return {
        "w1": 0.10 * jax.random.normal(ks[0], (128, 3, 4, 4), f32),
        "b1": 0.01 * jax.random.normal(ks[1], (128,), f32),
        "w2": 0.05 * jax.random.normal(ks[2], (128, 128, 1, 1), f32),
        "b2": 0.01 * jax.random.normal(ks[3], (128,), f32),
        "w3": 0.05 * jax.random.normal(ks[4], (128, 128, 1, 1), f32),
        "b3": 0.01 * jax.random.normal(ks[5], (128,), f32),
        "w4": 0.05 * jax.random.normal(ks[6], (128, 128, 1, 1), f32),
        "b4": 0.01 * jax.random.normal(ks[7], (128,), f32),
        "w5": 0.05 * jax.random.normal(ks[8], (32, 128, 1, 1), f32),
        "b5": 0.01 * jax.random.normal(ks[9], (32,), f32),
        "wl": 0.10 * jax.random.normal(ks[10], (4, 32), f32),
        "bl": 0.01 * jax.random.normal(ks[11], (4,), f32),
    }


if __name__ == "__main__":
    key = jax.random.PRNGKey(0)
    pkey, xkey = jax.random.split(key)
    params = init_params(pkey)

    # Small NCHW input consistent with Conv2d(3, ..., 4, stride=4).
    x = jax.random.normal(xkey, (2, 3, 16, 16), jnp.float32)

    out = jax.block_until_ready(jax.jit(estimator_forward)(x, params))
    assert out.shape == (2, 4), out.shape

    ref = jax.block_until_ready(reference_forward(x, params))
    # bf16 MXU inputs with f32 accumulation vs a pure-f32 reference.
    np.testing.assert_allclose(np.asarray(out), np.asarray(ref),
                               rtol=5e-2, atol=5e-2)

    print("KERNEL_OK")
</pallas_src>

<mosaic_0001>
module attributes {stable_mosaic.version = 11 : i64} {
  func.func @kernel(%arg0: i32, %arg1: i32, %arg2: memref<2x16x64xbf16, #tpu.memory_space<vmem>>, %arg3: memref<64x128xbf16, #tpu.memory_space<vmem>>, %arg4: memref<1x128xf32, #tpu.memory_space<vmem>>, %arg5: memref<128x128xbf16, #tpu.memory_space<vmem>>, %arg6: memref<1x128xf32, #tpu.memory_space<vmem>>, %arg7: memref<128x128xbf16, #tpu.memory_space<vmem>>, %arg8: memref<1x128xf32, #tpu.memory_space<vmem>>, %arg9: memref<128x128xbf16, #tpu.memory_space<vmem>>, %arg10: memref<1x128xf32, #tpu.memory_space<vmem>>, %arg11: memref<128x32xbf16, #tpu.memory_space<vmem>>, %arg12: memref<1x32xf32, #tpu.memory_space<vmem>>, %arg13: memref<2x1x32xf32, #tpu.memory_space<vmem>>) attributes {dimension_semantics = [#tpu.dimension_semantics<parallel>, #tpu.dimension_semantics<arbitrary>], iteration_bounds = array<i64: 1, 1>, scalar_prefetch = 0 : i64, scratch_operands = 0 : i64, tpu.core_type = #tpu.core_type<tc>, window_params = [{transform_indices = @transform_0, window_bounds = array<i64: 2, 16, 64>}, {pipeline_mode = #tpu.pipeline_mode<synchronous>, transform_indices = @transform_1, window_bounds = array<i64: 64, 128>}, {pipeline_mode = #tpu.pipeline_mode<synchronous>, transform_indices = @transform_2, window_bounds = array<i64: 1, 128>}, {pipeline_mode = #tpu.pipeline_mode<synchronous>, transform_indices = @transform_3, window_bounds = array<i64: 128, 128>}, {pipeline_mode = #tpu.pipeline_mode<synchronous>, transform_indices = @transform_4, window_bounds = array<i64: 1, 128>}, {pipeline_mode = #tpu.pipeline_mode<synchronous>, transform_indices = @transform_5, window_bounds = array<i64: 128, 128>}, {pipeline_mode = #tpu.pipeline_mode<synchronous>, transform_indices = @transform_6, window_bounds = array<i64: 1, 128>}, {pipeline_mode = #tpu.pipeline_mode<synchronous>, transform_indices = @transform_7, window_bounds = array<i64: 128, 128>}, {pipeline_mode = #tpu.pipeline_mode<synchronous>, transform_indices = @transform_8, window_bounds = array<i64: 1, 128>}, {pipeline_mode = #tpu.pipeline_mode<synchronous>, transform_indices = @transform_9, window_bounds = array<i64: 128, 32>}, {pipeline_mode = #tpu.pipeline_mode<synchronous>, transform_indices = @transform_10, window_bounds = array<i64: 1, 32>}, {transform_indices = @transform_11, window_bounds = array<i64: 2, 1, 32>}]} {
    %c0 = arith.constant 0 : index
    %c0_0 = arith.constant 0 : index
    %c0_1 = arith.constant 0 : index
    %0 = vector.load %arg2[%c0, %c0_0, %c0_1] : memref<2x16x64xbf16, #tpu.memory_space<vmem>>, vector<2x16x64xbf16>
    %1 = vector.shape_cast %0 : vector<2x16x64xbf16> to vector<32x64xbf16>
    %c0_2 = arith.constant 0 : index
    %c0_3 = arith.constant 0 : index
    %2 = vector.load %arg3[%c0_2, %c0_3] : memref<64x128xbf16, #tpu.memory_space<vmem>>, vector<64x128xbf16>
    %cst = arith.constant dense<0.000000e+00> : vector<32x128xf32>
    %3 = tpu.matmul %1, %2, %cst {dimension_numbers = #tpu.dot_dimension_numbers<[1], [0], [0], [1], [0, 0, 1, 1], [], []>} : vector<32x64xbf16>, vector<64x128xbf16>, vector<32x128xf32> -> vector<32x128xf32>
    %c0_4 = arith.constant 0 : index
    %c0_5 = arith.constant 0 : index
    %4 = vector.load %arg4[%c0_4, %c0_5] : memref<1x128xf32, #tpu.memory_space<vmem>>, vector<1x128xf32>
    %5 = vector.broadcast %4 : vector<1x128xf32> to vector<32x128xf32>
    %6 = arith.addf %3, %5 : vector<32x128xf32>
    %cst_6 = arith.constant 0.000000e+00 : f32
    %7 = vector.broadcast %cst_6 : f32 to vector<32x128xf32>
    %8 = arith.cmpf oge, %6, %7 : vector<32x128xf32>
    %cst_7 = arith.constant 1.000000e-01 : f32
    %9 = vector.broadcast %cst_7 : f32 to vector<32x128xf32>
    %10 = arith.mulf %9, %6 : vector<32x128xf32>
    %11 = arith.select %8, %6, %10 : vector<32x128xi1>, vector<32x128xf32>
    %12 = arith.truncf %11 : vector<32x128xf32> to vector<32x128xbf16>
    %c0_8 = arith.constant 0 : index
    %c0_9 = arith.constant 0 : index
    %13 = vector.load %arg5[%c0_8, %c0_9] : memref<128x128xbf16, #tpu.memory_space<vmem>>, vector<128x128xbf16>
    %cst_10 = arith.constant dense<0.000000e+00> : vector<32x128xf32>
    %14 = tpu.matmul %12, %13, %cst_10 {dimension_numbers = #tpu.dot_dimension_numbers<[1], [0], [0], [1], [0, 0, 1, 1], [], []>} : vector<32x128xbf16>, vector<128x128xbf16>, vector<32x128xf32> -> vector<32x128xf32>
    %c0_11 = arith.constant 0 : index
    %c0_12 = arith.constant 0 : index
    %15 = vector.load %arg6[%c0_11, %c0_12] : memref<1x128xf32, #tpu.memory_space<vmem>>, vector<1x128xf32>
    %16 = vector.broadcast %15 : vector<1x128xf32> to vector<32x128xf32>
    %17 = arith.addf %14, %16 : vector<32x128xf32>
    %cst_13 = arith.constant 0.000000e+00 : f32
    %18 = vector.broadcast %cst_13 : f32 to vector<32x128xf32>
    %19 = arith.cmpf oge, %17, %18 : vector<32x128xf32>
    %cst_14 = arith.constant 1.000000e-01 : f32
    %20 = vector.broadcast %cst_14 : f32 to vector<32x128xf32>
    %21 = arith.mulf %20, %17 : vector<32x128xf32>
    %22 = arith.select %19, %17, %21 : vector<32x128xi1>, vector<32x128xf32>
    %23 = arith.truncf %22 : vector<32x128xf32> to vector<32x128xbf16>
    %c0_15 = arith.constant 0 : index
    %c0_16 = arith.constant 0 : index
    %24 = vector.load %arg7[%c0_15, %c0_16] : memref<128x128xbf16, #tpu.memory_space<vmem>>, vector<128x128xbf16>
    %cst_17 = arith.constant dense<0.000000e+00> : vector<32x128xf32>
    %25 = tpu.matmul %23, %24, %cst_17 {dimension_numbers = #tpu.dot_dimension_numbers<[1], [0], [0], [1], [0, 0, 1, 1], [], []>} : vector<32x128xbf16>, vector<128x128xbf16>, vector<32x128xf32> -> vector<32x128xf32>
    %c0_18 = arith.constant 0 : index
    %c0_19 = arith.constant 0 : index
    %26 = vector.load %arg8[%c0_18, %c0_19] : memref<1x128xf32, #tpu.memory_space<vmem>>, vector<1x128xf32>
    %27 = vector.broadcast %26 : vector<1x128xf32> to vector<32x128xf32>
    %28 = arith.addf %25, %27 : vector<32x128xf32>
    %cst_20 = arith.constant 0.000000e+00 : f32
    %29 = vector.broadcast %cst_20 : f32 to vector<32x128xf32>
    %30 = arith.cmpf oge, %28, %29 : vector<32x128xf32>
    %cst_21 = arith.constant 1.000000e-01 : f32
    %31 = vector.broadcast %cst_21 : f32 to vector<32x128xf32>
    %32 = arith.mulf %31, %28 : vector<32x128xf32>
    %33 = arith.select %30, %28, %32 : vector<32x128xi1>, vector<32x128xf32>
    %34 = arith.truncf %33 : vector<32x128xf32> to vector<32x128xbf16>
    %c0_22 = arith.constant 0 : index
    %c0_23 = arith.constant 0 : index
    %35 = vector.load %arg9[%c0_22, %c0_23] : memref<128x128xbf16, #tpu.memory_space<vmem>>, vector<128x128xbf16>
    %cst_24 = arith.constant dense<0.000000e+00> : vector<32x128xf32>
    %36 = tpu.matmul %34, %35, %cst_24 {dimension_numbers = #tpu.dot_dimension_numbers<[1], [0], [0], [1], [0, 0, 1, 1], [], []>} : vector<32x128xbf16>, vector<128x128xbf16>, vector<32x128xf32> -> vector<32x128xf32>
    %c0_25 = arith.constant 0 : index
    %c0_26 = arith.constant 0 : index
    %37 = vector.load %arg10[%c0_25, %c0_26] : memref<1x128xf32, #tpu.memory_space<vmem>>, vector<1x128xf32>
    %38 = vector.broadcast %37 : vector<1x128xf32> to vector<32x128xf32>
    %39 = arith.addf %36, %38 : vector<32x128xf32>
    %cst_27 = arith.constant 0.000000e+00 : f32
    %40 = vector.broadcast %cst_27 : f32 to vector<32x128xf32>
    %41 = arith.cmpf oge, %39, %40 : vector<32x128xf32>
    %cst_28 = arith.constant 1.000000e-01 : f32
    %42 = vector.broadcast %cst_28 : f32 to vector<32x128xf32>
    %43 = arith.mulf %42, %39 : vector<32x128xf32>
    %44 = arith.select %41, %39, %43 : vector<32x128xi1>, vector<32x128xf32>
    %45 = arith.truncf %44 : vector<32x128xf32> to vector<32x128xbf16>
    %c0_29 = arith.constant 0 : index
    %c0_30 = arith.constant 0 : index
    %46 = vector.load %arg11[%c0_29, %c0_30] : memref<128x32xbf16, #tpu.memory_space<vmem>>, vector<128x32xbf16>
    %cst_31 = arith.constant dense<0.000000e+00> : vector<32x32xf32>
    %47 = tpu.matmul %45, %46, %cst_31 {dimension_numbers = #tpu.dot_dimension_numbers<[1], [0], [0], [1], [0, 0, 1, 1], [], []>} : vector<32x128xbf16>, vector<128x32xbf16>, vector<32x32xf32> -> vector<32x32xf32>
    %c0_32 = arith.constant 0 : index
    %c0_33 = arith.constant 0 : index
    %48 = vector.load %arg12[%c0_32, %c0_33] : memref<1x32xf32, #tpu.memory_space<vmem>>, vector<1x32xf32>
    %49 = vector.broadcast %48 : vector<1x32xf32> to vector<32x32xf32>
    %50 = arith.addf %47, %49 : vector<32x32xf32>
    %51 = vector.shape_cast %50 : vector<32x32xf32> to vector<2x16x32xf32>
    %cst_34 = arith.constant dense<0.000000e+00> : vector<2x32xf32>
    %52 = vector.multi_reduction <add>, %51, %cst_34 [1] : vector<2x16x32xf32> to vector<2x32xf32>
    %53 = vector.shape_cast %52 : vector<2x32xf32> to vector<2x1x32xf32>
    %c0_i32 = arith.constant 0 : i32
    %54 = arith.cmpi eq, %arg1, %c0_i32 : i32
    %55 = arith.extui %54 : i1 to i32
    %c0_i32_35 = arith.constant 0 : i32
    %56 = arith.cmpi ne, %55, %c0_i32_35 : i32
    scf.if %56 {
      %cst_42 = arith.constant 0.000000e+00 : f32
      %60 = vector.broadcast %cst_42 : f32 to vector<2x1x32xf32>
      %c0_43 = arith.constant 0 : index
      %c0_44 = arith.constant 0 : index
      %c0_45 = arith.constant 0 : index
      %61 = vector.load %arg13[%c0_43, %c0_44, %c0_45] : memref<2x1x32xf32, #tpu.memory_space<vmem>>, vector<2x1x32xf32>
      tpu.vector_store %arg13[%c0_43, %c0_44, %c0_45], %60 {strides = array<i32>} : memref<2x1x32xf32, #tpu.memory_space<vmem>>, vector<2x1x32xf32>,
    } else {
    }
    %c0_36 = arith.constant 0 : index
    %c0_37 = arith.constant 0 : index
    %c0_38 = arith.constant 0 : index
    %57 = vector.load %arg13[%c0_36, %c0_37, %c0_38] : memref<2x1x32xf32, #tpu.memory_space<vmem>>, vector<2x1x32xf32>
    %58 = arith.addf %57, %53 : vector<2x1x32xf32>
    %c0_39 = arith.constant 0 : index
    %c0_40 = arith.constant 0 : index
    %c0_41 = arith.constant 0 : index
    %59 = vector.load %arg13[%c0_39, %c0_40, %c0_41] : memref<2x1x32xf32, #tpu.memory_space<vmem>>, vector<2x1x32xf32>
    tpu.vector_store %arg13[%c0_39, %c0_40, %c0_41], %58 {strides = array<i32>} : memref<2x1x32xf32, #tpu.memory_space<vmem>>, vector<2x1x32xf32>,
    return
  }
  func.func @transform_0(%arg0: i32, %arg1: i32) -> (i32, i32, i32) {
    %c0_i32 = arith.constant 0 : i32
    %c0_i32_0 = arith.constant 0 : i32
    return %arg0, %arg1, %c0_i32 : i32, i32, i32
  }
  func.func @transform_1(%arg0: i32, %arg1: i32) -> (i32, i32) {
    %c0_i32 = arith.constant 0 : i32
    %c0_i32_0 = arith.constant 0 : i32
    %c0_i32_1 = arith.constant 0 : i32
    return %c0_i32, %c0_i32_0 : i32, i32
  }
  func.func @transform_2(%arg0: i32, %arg1: i32) -> (i32, i32) {
    %c0_i32 = arith.constant 0 : i32
    %c0_i32_0 = arith.constant 0 : i32
    %c0_i32_1 = arith.constant 0 : i32
    return %c0_i32, %c0_i32_0 : i32, i32
  }
  func.func @transform_3(%arg0: i32, %arg1: i32) -> (i32, i32) {
    %c0_i32 = arith.constant 0 : i32
    %c0_i32_0 = arith.constant 0 : i32
    %c0_i32_1 = arith.constant 0 : i32
    return %c0_i32, %c0_i32_0 : i32, i32
  }
  func.func @transform_4(%arg0: i32, %arg1: i32) -> (i32, i32) {
    %c0_i32 = arith.constant 0 : i32
    %c0_i32_0 = arith.constant 0 : i32
    %c0_i32_1 = arith.constant 0 : i32
    return %c0_i32, %c0_i32_0 : i32, i32
  }
  func.func @transform_5(%arg0: i32, %arg1: i32) -> (i32, i32) {
    %c0_i32 = arith.constant 0 : i32
    %c0_i32_0 = arith.constant 0 : i32
    %c0_i32_1 = arith.constant 0 : i32
    return %c0_i32, %c0_i32_0 : i32, i32
  }
  func.func @transform_6(%arg0: i32, %arg1: i32) -> (i32, i32) {
    %c0_i32 = arith.constant 0 : i32
    %c0_i32_0 = arith.constant 0 : i32
    %c0_i32_1 = arith.constant 0 : i32
    return %c0_i32, %c0_i32_0 : i32, i32
  }
  func.func @transform_7(%arg0: i32, %arg1: i32) -> (i32, i32) {
    %c0_i32 = arith.constant 0 : i32
    %c0_i32_0 = arith.constant 0 : i32
    %c0_i32_1 = arith.constant 0 : i32
    return %c0_i32, %c0_i32_0 : i32, i32
  }
  func.func @transform_8(%arg0: i32, %arg1: i32) -> (i32, i32) {
    %c0_i32 = arith.constant 0 : i32
    %c0_i32_0 = arith.constant 0 : i32
    %c0_i32_1 = arith.constant 0 : i32
    return %c0_i32, %c0_i32_0 : i32, i32
  }
  func.func @transform_9(%arg0: i32, %arg1: i32) -> (i32, i32) {
    %c0_i32 = arith.constant 0 : i32
    %c0_i32_0 = arith.constant 0 : i32
    %c0_i32_1 = arith.constant 0 : i32
    return %c0_i32, %c0_i32_0 : i32, i32
  }
  func.func @transform_10(%arg0: i32, %arg1: i32) -> (i32, i32) {
    %c0_i32 = arith.constant 0 : i32
    %c0_i32_0 = arith.constant 0 : i32
    %c0_i32_1 = arith.constant 0 : i32
    return %c0_i32, %c0_i32_0 : i32, i32
  }
  func.func @transform_11(%arg0: i32, %arg1: i32) -> (i32, i32, i32) {
    %c0_i32 = arith.constant 0 : i32
    %c0_i32_0 = arith.constant 0 : i32
    %c0_i32_1 = arith.constant 0 : i32
    return %arg0, %c0_i32, %c0_i32_0 : i32, i32, i32
  }
}

</mosaic_0001>

<bundles_post_ra>
// kernel: estimator_forward.1
= control target key start
LH: loop header
LB: loop body
LE: loop exit
PB: predicated region body
PF: predicated region fallthrough
CT: control target
= control target key end

     0   :  { %vm92_vm0 = vcmask 523264   ;;  %s1157_s1 = inlined_call_operand.vmem [shape: bf16[64,128], index: 1, kind: input, shape index: {}]   ;;  %s1158_s0 = inlined_call_operand.vmem [shape: bf16[2,16,64], index: 0, kind: input, shape index: {}]   ;;  %s1159_s3 = inlined_call_operand.vmem [shape: bf16[128,128], index: 3, kind: input, shape index: {}]   ;;  %s1160_s5 = inlined_call_operand.vmem [shape: bf16[128,128], index: 5, kind: input, shape index: {}]   ;;  %s1161_s2 = inlined_call_operand.vmem [shape: f32[1,128], index: 2, kind: input, shape index: {}]   ;;  %s1162_s7 = inlined_call_operand.vmem [shape: bf16[128,128], index: 7, kind: input, shape index: {}]   ;;  %s1163_s4 = inlined_call_operand.vmem [shape: f32[1,128], index: 4, kind: input, shape index: {}]   ;;  %s1164_s9 = inlined_call_operand.vmem [shape: bf16[128,32], index: 9, kind: input, shape index: {}]   ;;  %s1165_s6 = inlined_call_operand.vmem [shape: f32[1,128], index: 6, kind: input, shape index: {}]   ;;  %s1166_s8 = inlined_call_operand.vmem [shape: f32[1,128], index: 8, kind: input, shape index: {}]   ;;  %s1167_s11 = inlined_call_operand.vmem [shape: f32[2,1,32], index: 11, kind: output, shape index: {}]   ;;  %s1168_s10 = inlined_call_operand.vmem [shape: f32[1,32], index: 10, kind: input, shape index: {}]  }
   0x1   :  { %v905_v0 = vld [vmem:[%s1157_s1 + $0x18] sm:$0xff]   ;;  %v906_v1 = vld [vmem:[%s1157_s1 + $0x10] sm:$0xff]   ;;  %v907_v2 = vld [vmem:[%s1157_s1 + $0x8] sm:$0xff]  }
   0x2   :  { %812 = vmatprep.subr.bf16.mxu0 %v905_v0  ;;  %v909_v3 = vld [vmem:[%s1158_s0] sm:$0xff]   ;;  %v911_v4 = vld [vmem:[%s1159_s3 + $0x38] sm:$0xff]   ;;  %v912_v5 = vld [vmem:[%s1159_s3 + $0x30] sm:$0xff]  }
   0x3   :  { %813 = vmatpush3.bf16.msra.mxu0 %v905_v0  ;;  %820 = vmatprep.mubr.msk.bf16.mxu0 %vm92_vm0, %v909_v3  ;;  %v908_v6 = vld [vmem:[%s1157_s1] sm:$0xff]   ;;  %v913_v7 = vld [vmem:[%s1159_s3 + $0x28] sm:$0xff]   ;;  %v915_v10 = vld [vmem:[%s1159_s3 + $0x18] sm:$0xff]  }
   0x4   :  { %814 = vmatprep.subr.bf16.mxu0 %v906_v1  ;;  %824 = vmatprep.subr.bf16.mxu1 %v911_v4  ;;  %v910_v8 = vld [vmem:[%s1158_s0 + $0x8] sm:$0xff]   ;;  %v914_v9 = vld [vmem:[%s1159_s3 + $0x20] sm:$0xff]   ;;  %v916_v11 = vld [vmem:[%s1159_s3 + $0x10] sm:$0xff]  }
   0x5   :  { %825 = vmatpush3.bf16.msra.mxu1 %v911_v4  ;;  %v917_v12 = vld [vmem:[%s1159_s3 + $0x8] sm:$0xff]   ;;  %v918_v13 = vld [vmem:[%s1159_s3] sm:$0xff]   ;;  %v919_v14 = vld [vmem:[%s1160_s5 + $0x38] sm:$0xff]  }
   0x6   :  { %826 = vmatprep.subr.bf16.mxu1 %v912_v5  ;;  %v920_v15 = vld [vmem:[%s1160_s5 + $0x30] sm:$0xff]   ;;  %v921_v16 = vld [vmem:[%s1160_s5 + $0x28] sm:$0xff]   ;;  %v922_v17 = vld [vmem:[%s1160_s5 + $0x20] sm:$0xff]  }
   0x7   :  { %815 = vmatpush3.bf16.msra.mxu0 %v906_v1  ;;  %v923_v18 = vld [vmem:[%s1160_s5 + $0x18] sm:$0xff]   ;;  %v721_v20 = vld [vmem:[%s1161_s2] ss:$0 sm:$0xff]  ;;  %v924_v38 = vld [vmem:[%s1160_s5 + $0x10] sm:$0xff]  }
   0x8   :  { %816 = vmatprep.subr.bf16.mxu0 %v907_v2  ;;  %v925_v39 = vld [vmem:[%s1160_s5 + $0x8] sm:$0xff]   ;;  %v926_v40 = vld [vmem:[%s1160_s5] sm:$0xff]   ;;  %v927_v41 = vld [vmem:[%s1162_s7 + $0x38] sm:$0xff]  }
   0x9   :  { %827 = vmatpush3.bf16.msra.mxu1 %v912_v5  ;;  %v928_v42 = vld [vmem:[%s1162_s7 + $0x30] sm:$0xff]   ;;  %v929_v43 = vld [vmem:[%s1162_s7 + $0x28] sm:$0xff]   ;;  %v930_v44 = vld [vmem:[%s1162_s7 + $0x20] sm:$0xff]  }
   0xa   :  { %828 = vmatprep.subr.bf16.mxu1 %v913_v7  ;;  %v931_v45 = vld [vmem:[%s1162_s7 + $0x18] sm:$0xff]   ;;  %v730_v47 = vld [vmem:[%s1163_s4] ss:$0 sm:$0xff]  ;;  %v932_v1 = vld [vmem:[%s1162_s7 + $0x10] sm:$0xff]  }
   0xb   :  { %817 = vmatpush3.bf16.msra.mxu0 %v907_v2  ;;  %v933_v2 = vld [vmem:[%s1162_s7 + $0x8] sm:$0xff]   ;;  %v934_v3 = vld [vmem:[%s1162_s7] sm:$0xff]   ;;  %v935_v4 = vld [vmem:[%s1164_s9 + $0x38] sm:$0xff]  }
   0xc   :  { %818 = vmatprep.subr.bf16.mxu0 %v908_v6  ;;  %v936_v5 = vld [vmem:[%s1164_s9 + $0x30] sm:$0xff]  }
   0xd   :  { %829 = vmatpush3.bf16.msra.mxu1 %v913_v7  ;;  %v938_v7 = vld [vmem:[%s1164_s9 + $0x20] sm:$0xff]  }
   0xe   :  { %830 = vmatprep.subr.bf16.mxu1 %v914_v9 }
   0xf   :  { %819 = vmatpush3.bf16.msra.mxu0 %v908_v6  ;;  %v937_v6 = vld [vmem:[%s1164_s9 + $0x28] sm:$0xff]  }
  0x10   :  { %844 = vmatprep.subr.bf16.mxu0 %v919_v14 }
  0x11   :  { %831 = vmatpush3.bf16.msra.mxu1 %v914_v9 }
  0x12   :  { %821 = vmatmul.mubr.msk.bf16.vlgmr.msra.gmra.mxu0 %vm92_vm0, %v910_v8  ;;  %832 = vmatprep.subr.bf16.mxu1 %v915_v10  ;;  %v939_v8 = vld [vmem:[%s1164_s9 + $0x18] sm:$0xff]  }
  0x13   :  { %845 = vmatpush3.bf16.msra.mxu0 %v919_v14 }
  0x14   :  { %846 = vmatprep.subr.bf16.mxu0 %v920_v15 }
  0x15   :  { %833 = vmatpush3.bf16.msra.mxu1 %v915_v10  ;;  %v739_v10 = vld [vmem:[%s1165_s6] ss:$0 sm:$0xff] }
  0x16   :  { %834 = vmatprep.subr.bf16.mxu1 %v916_v11 }
  0x17   :  { %847 = vmatpush3.bf16.msra.mxu0 %v920_v15 }
  0x18   :  { %848 = vmatprep.subr.bf16.mxu0 %v921_v16 }
  0x19   :  { %835 = vmatpush3.bf16.msra.mxu1 %v916_v11 }
  0x1a   :  { %836 = vmatprep.subr.bf16.mxu1 %v917_v12 }
  0x1b   :  { %849 = vmatpush3.bf16.msra.mxu0 %v921_v16 }
  0x1c   :  { %850 = vmatprep.subr.bf16.mxu0 %v922_v17 }
  0x1d   :  { %837 = vmatpush3.bf16.msra.mxu1 %v917_v12 }
  0x1e   :  { %838 = vmatprep.subr.bf16.mxu1 %v918_v13 }
  0x1f   :  { %851 = vmatpush3.bf16.msra.mxu0 %v922_v17 }
  0x20   :  { %852 = vmatprep.subr.bf16.mxu0 %v923_v18 }
  0x21   :  { %839 = vmatpush3.bf16.msra.mxu1 %v918_v13 }
  0x22   :  { %864 = vmatprep.subr.bf16.mxu1 %v927_v41 }
  0x23   :  { %853 = vmatpush3.bf16.msra.mxu0 %v923_v18 }
  0x24   :  { %854 = vmatprep.subr.bf16.mxu0 %v924_v38 }
  0x27   :  { %855 = vmatpush3.bf16.msra.mxu0 %v924_v38 }
  0x28   :  { %856 = vmatprep.subr.bf16.mxu0 %v925_v39 }
  0x2b   :  { %857 = vmatpush3.bf16.msra.mxu0 %v925_v39 }
  0x2c   :  { %858 = vmatprep.subr.bf16.mxu0 %v926_v40 }
  0x2f   :  { %859 = vmatpush3.bf16.msra.mxu0 %v926_v40 }
  0x30   :  { %884 = vmatprep.subr.bf16.mxu0 %v935_v4 }
  0xd2   :  { %v822_v19 = vpop.f32.mrf.mxu0 }
  0xd3   :  { %v142_v23 = vadd.f32 %v822_v19, %v721_v20 }
  0xd4   :  { %v133_v21 = vpop.f32.mrf.mxu0 }
  0xd5   :  { %v134_v22 = vadd.f32 %v721_v20, %v133_v21  ;;  %v154_v30 = vmul.f32 0.1, %v142_v23  ;;  %vm150_vm3 = vcmp.ge.f32.partialorder %v142_v23, 0.0 }
  0xd6   :  { %v823_v24 = vpop.f32.mrf.mxu0 }
  0xd7   :  { %v145_v25 = vadd.f32 %v823_v24, %v721_v20  ;;  %v152_v27 = vmul.f32 0.1, %v134_v22  ;;  %vm148_vm2 = vcmp.ge.f32.partialorder %v134_v22, 0.0  ;;  %v158_v36 = vsel %vm150_vm3, %v142_v23, %v154_v30  ;;  %v942_v30 = vld [vmem:[%s1164_s9] sm:$0xff]  }
  0xd8   :  { %v136_v26 = vpop.f32.mrf.mxu0 }
  0xd9   :  { %vm151_vm1 = vcmp.ge.f32.partialorder %v145_v25, 0.0  ;;  %v155_v28 = vmul.f32 0.1, %v145_v25  ;;  %v137_v29 = vadd.f32 %v721_v20, %v136_v26  ;;  %v156_v33 = vsel %vm148_vm2, %v134_v22, %v152_v27 }
  0xda   :  { %vm684_vm2 = vcmask 261120  }
  0xdb   :  { %v153_v31 = vmul.f32 0.1, %v137_v29  ;;  %vm149_vm4 = vcmp.ge.f32.partialorder %v137_v29, 0.0  ;;  %v159_v32 = vsel %vm151_vm1, %v145_v25, %v155_v28  ;;  %v940_v28 = vld [vmem:[%s1164_s9 + $0x10] sm:$0xff]   ;;  %vm707_vm1 = vcmask 253952  }
  0xdc   :  { %v161_v37 = vpack.c.bf16 %v159_v32, %v158_v36  ;;  %v748_v32 = vld [vmem:[%s1166_s8] ss:$0 sm:$0xff] }
  0xdd   :  { %v157_v34 = vsel %vm149_vm4, %v137_v29, %v153_v31  ;;  %v941_v29 = vld [vmem:[%s1164_s9 + $0x8] sm:$0xff]  }
  0xde   :  { %v160_v35 = vpack.c.bf16 %v157_v34, %v156_v33 }
  0xe0   :  { %840 = vmatprep.mubr.bf16.mxu1 %v160_v35 }
  0xe1   :  { %841 = vmatmul.mubr.bf16.vlgmr.msra.gmra.mxu1 %v161_v37 }
  0xe2   :  { %865 = vmatpush3.bf16.msra.mxu1 %v927_v41 }
  0xe3   :  { %866 = vmatprep.subr.bf16.mxu1 %v928_v42 }
  0xe6   :  { %867 = vmatpush3.bf16.msra.mxu1 %v928_v42 }
  0xe7   :  { %868 = vmatprep.subr.bf16.mxu1 %v929_v43 }
  0xea   :  { %869 = vmatpush3.bf16.msra.mxu1 %v929_v43 }
  0xeb   :  { %870 = vmatprep.subr.bf16.mxu1 %v930_v44 }
  0xee   :  { %871 = vmatpush3.bf16.msra.mxu1 %v930_v44 }
  0xef   :  { %872 = vmatprep.subr.bf16.mxu1 %v931_v45 }
  0xf2   :  { %873 = vmatpush3.bf16.msra.mxu1 %v931_v45 }
  0xf3   :  { %874 = vmatprep.subr.bf16.mxu1 %v932_v1 }
  0xf6   :  { %875 = vmatpush3.bf16.msra.mxu1 %v932_v1 }
  0xf7   :  { %876 = vmatprep.subr.bf16.mxu1 %v933_v2 }
  0xfa   :  { %877 = vmatpush3.bf16.msra.mxu1 %v933_v2 }
  0xfb   :  { %878 = vmatprep.subr.bf16.mxu1 %v934_v3 }
  0xfe   :  { %879 = vmatpush3.bf16.msra.mxu1 %v934_v3 }
 0x1a1   :  { %v842_v46 = vpop.f32.mrf.mxu1 }
 0x1a2   :  { %v276_v50 = vadd.f32 %v842_v46, %v730_v47 }
 0x1a3   :  { %v267_v48 = vpop.f32.mrf.mxu1 }
 0x1a4   :  { %v268_v49 = vadd.f32 %v730_v47, %v267_v48  ;;  %v288_v57 = vmul.f32 0.1, %v276_v50  ;;  %vm284_vm7 = vcmp.ge.f32.partialorder %v276_v50, 0.0 }
 0x1a5   :  { %v843_v51 = vpop.f32.mrf.mxu1 }
 0x1a6   :  { %v279_v52 = vadd.f32 %v843_v51, %v730_v47  ;;  %v286_v54 = vmul.f32 0.1, %v268_v49  ;;  %vm282_vm6 = vcmp.ge.f32.partialorder %v268_v49, 0.0  ;;  %v292_v62 = vsel %vm284_vm7, %v276_v50, %v288_v57 }
 0x1a7   :  { %v270_v53 = vpop.f32.mrf.mxu1  ;;  %v943_v50 = vmov 0.0  }
 0x1a8   :  { %vm285_vm5 = vcmp.ge.f32.partialorder %v279_v52, 0.0  ;;  %v289_v55 = vmul.f32 0.1, %v279_v52  ;;  %v271_v56 = vadd.f32 %v730_v47, %v270_v53  ;;  %v290_v60 = vsel %vm282_vm6, %v268_v49, %v286_v54  ;;  %709 = vst.msk [vmem:[%s1167_s11 + $0x1] sm:$0x1] %vm707_vm1, %v943_v50 }
 0x1a9   :  { %708 = vst.msk [vmem:[%s1167_s11] sm:$0x1] %vm707_vm1, %v943_v50 }
 0x1aa   :  { %vm283_vm8 = vcmp.ge.f32.partialorder %v271_v56, 0.0  ;;  %v287_v58 = vmul.f32 0.1, %v271_v56  ;;  %v293_v59 = vsel %vm285_vm5, %v279_v52, %v289_v55  ;;  %v757_v52 = vld [vmem:[%s1168_s10] ss:$0 sm:$0xff] }
 0x1ab   :  { %v295_v0 = vpack.c.bf16 %v293_v59, %v292_v62 }
 0x1ac   :  { %v291_v61 = vsel %vm283_vm8, %v271_v56, %v287_v58 }
 0x1ad   :  { %v294_v63 = vpack.c.bf16 %v291_v61, %v290_v60 }
 0x1af   :  { %860 = vmatprep.mubr.bf16.mxu0 %v294_v63 }
 0x1b0   :  { %861 = vmatmul.mubr.bf16.vlgmr.msra.gmra.mxu0 %v295_v0 }
 0x1b1   :  { %885 = vmatpush3.bf16.msra.mxu0 %v935_v4 }
 0x1b2   :  { %886 = vmatprep.subr.bf16.mxu0 %v936_v5 }
 0x1b5   :  { %887 = vmatpush3.bf16.msra.mxu0 %v936_v5 }
 0x1b6   :  { %888 = vmatprep.subr.bf16.mxu0 %v937_v6 }
 0x1b9   :  { %889 = vmatpush3.bf16.msra.mxu0 %v937_v6 }
 0x1ba   :  { %890 = vmatprep.subr.bf16.mxu0 %v938_v7 }
 0x1bd   :  { %891 = vmatpush3.bf16.msra.mxu0 %v938_v7 }
 0x1be   :  { %892 = vmatprep.subr.bf16.mxu0 %v939_v8 }
 0x1c1   :  { %893 = vmatpush3.bf16.msra.mxu0 %v939_v8 }
 0x1c2   :  { %894 = vmatprep.subr.bf16.mxu0 %v940_v28 }
 0x1c5   :  { %895 = vmatpush3.bf16.msra.mxu0 %v940_v28 }
 0x1c6   :  { %896 = vmatprep.subr.bf16.mxu0 %v941_v29 }
 0x1c9   :  { %897 = vmatpush3.bf16.msra.mxu0 %v941_v29 }
 0x1ca   :  { %898 = vmatprep.subr.bf16.mxu0 %v942_v30 }
 0x1cd   :  { %899 = vmatpush3.bf16.msra.mxu0 %v942_v30 }
 0x270   :  { %v862_v9 = vpop.f32.mrf.mxu0 }
 0x271   :  { %v410_v13 = vadd.f32 %v862_v9, %v739_v10 }
 0x272   :  { %v401_v11 = vpop.f32.mrf.mxu0 }
 0x273   :  { %v402_v12 = vadd.f32 %v739_v10, %v401_v11  ;;  %v422_v20 = vmul.f32 0.1, %v410_v13  ;;  %vm418_vm11 = vcmp.ge.f32.partialorder %v410_v13, 0.0  ;;  %v711_v11 = vld [vmem:[%s1167_s11 + $0x1] sm:$0x1] }
 0x274   :  { %v863_v14 = vpop.f32.mrf.mxu0 }
 0x275   :  { %v413_v15 = vadd.f32 %v863_v14, %v739_v10  ;;  %v420_v17 = vmul.f32 0.1, %v402_v12  ;;  %vm416_vm10 = vcmp.ge.f32.partialorder %v402_v12, 0.0  ;;  %v426_v25 = vsel %vm418_vm11, %v410_v13, %v422_v20  ;;  %v710_v14 = vld [vmem:[%s1167_s11] sm:$0x1] }
 0x276   :  { %v404_v16 = vpop.f32.mrf.mxu0 }
 0x277   :  { %vm419_vm9 = vcmp.ge.f32.partialorder %v413_v15, 0.0  ;;  %v423_v18 = vmul.f32 0.1, %v413_v15  ;;  %v405_v19 = vadd.f32 %v739_v10, %v404_v16  ;;  %v424_v23 = vsel %vm416_vm10, %v402_v12, %v420_v17 }
 0x279   :  { %vm417_vm12 = vcmp.ge.f32.partialorder %v405_v19, 0.0  ;;  %v421_v21 = vmul.f32 0.1, %v405_v19  ;;  %v427_v22 = vsel %vm419_vm9, %v413_v15, %v423_v18 }
 0x27a   :  { %v429_v27 = vpack.c.bf16 %v427_v22, %v426_v25 }
 0x27b   :  { %v425_v24 = vsel %vm417_vm12, %v405_v19, %v421_v21 }
 0x27c   :  { %v428_v26 = vpack.c.bf16 %v425_v24, %v424_v23 }
 0x27e   :  { %880 = vmatprep.mubr.bf16.mxu1 %v428_v26 }
 0x27f   :  { %881 = vmatmul.mubr.bf16.vlgmr.msra.gmra.mxu1 %v429_v27 }
 0x33f   :  { %v882_v31 = vpop.f32.mrf.mxu1 }
 0x340   :  { %v544_v35 = vadd.f32 %v882_v31, %v748_v32 }
 0x341   :  { %v535_v33 = vpop.f32.mrf.mxu1 }
 0x342   :  { %v536_v34 = vadd.f32 %v748_v32, %v535_v33  ;;  %v556_v42 = vmul.f32 0.1, %v544_v35  ;;  %vm552_vm15 = vcmp.ge.f32.partialorder %v544_v35, 0.0 }
 0x343   :  { %v883_v36 = vpop.f32.mrf.mxu1 }
 0x344   :  { %v547_v37 = vadd.f32 %v883_v36, %v748_v32  ;;  %v554_v39 = vmul.f32 0.1, %v536_v34  ;;  %vm550_vm14 = vcmp.ge.f32.partialorder %v536_v34, 0.0  ;;  %v560_v47 = vsel %vm552_vm15, %v544_v35, %v556_v42 }
 0x345   :  { %v538_v38 = vpop.f32.mrf.mxu1 }
 0x346   :  { %vm553_vm13 = vcmp.ge.f32.partialorder %v547_v37, 0.0  ;;  %v557_v40 = vmul.f32 0.1, %v547_v37  ;;  %v539_v41 = vadd.f32 %v748_v32, %v538_v38  ;;  %v558_v45 = vsel %vm550_vm14, %v536_v34, %v554_v39 }
 0x348   :  { %vm551_vm0 = vcmp.ge.f32.partialorder %v539_v41, 0.0  ;;  %v555_v43 = vmul.f32 0.1, %v539_v41  ;;  %v561_v44 = vsel %vm553_vm13, %v547_v37, %v557_v40 }
 0x349   :  { %v563_v49 = vpack.c.bf16 %v561_v44, %v560_v47 }
 0x34a   :  { %v559_v46 = vsel %vm551_vm0, %v539_v41, %v555_v43 }
 0x34b   :  { %v562_v48 = vpack.c.bf16 %v559_v46, %v558_v45 }
 0x34d   :  { %900 = vmatprep.mubr.bf16.mxu0 %v562_v48 }
 0x34e   :  { %901 = vmatmul.mubr.bf16.vlgmr.msra.gmra.mxu0 %v563_v49 }
 0x40e   :  { %v902_v51 = vpop.f32.mrf.mxu0 }
 0x40f   :  { %v678_v54 = vadd.f32 %v902_v51, %v757_v52 }
 0x410   :  { %v669_v53 = vpop.f32.mrf.mxu0 }
 0x411   :  { %v670_v56 = vadd.f32 %v757_v52, %v669_v53  ;;  %v694_v59 = vsel %vm684_vm2, %v678_v54, 0.0 }
 0x412   :  { %v903_v55 = vpop.f32.mrf.mxu0 }
 0x413   :  { %v681_v57 = vadd.f32 %v903_v55, %v757_v52  ;;  %v685_v63 = vsel %vm684_vm2, %v670_v56, 0.0 }
 0x414   :  { %v672_v58 = vpop.f32.mrf.mxu0 }
 0x415   :  { %v695_v60 = vsel %vm684_vm2, %v681_v57, 0.0  ;;  %v673_v61 = vadd.f32 %v757_v52, %v672_v58 }
 0x416   :  { %v696_v62 = vadd.f32 %v695_v60, %v694_v59 }
 0x417   :  { %v686_v0 = vsel %vm684_vm2, %v673_v61, 0.0 }
 0x418   :  { %v697_v1 = vrot.slane %v696_v62, 4  ;;  %v687_v2 = vadd.f32 %v686_v0, %v685_v63 }
 0x41a   :  { %v698_v3 = vadd.f32 %v697_v1, %v696_v62  ;;  %v688_v4 = vrot.slane %v687_v2, 4 }
 0x41c   :  { %v699_v5 = vrot.slane %v698_v3, 2  ;;  %v689_v6 = vadd.f32 %v688_v4, %v687_v2 }
 0x41e   :  { %v700_v7 = vadd.f32 %v699_v5, %v698_v3  ;;  %v690_v8 = vrot.slane %v689_v6, 2 }
 0x420   :  { %v701_v9 = vrot.slane %v700_v7, 1  ;;  %v691_v10 = vadd.f32 %v690_v8, %v689_v6 }
 0x422   :  { %v702_v12 = vadd.f32 %v701_v9, %v700_v7  ;;  %v692_v13 = vrot.slane %v691_v10, 1 }
 0x424   :  { %v713_v15 = vadd.f32 %v711_v11, %v702_v12  ;;  %v693_v16 = vadd.f32 %v692_v13, %v691_v10 }
 0x426   :  { %716 = vst.msk [vmem:[%s1167_s11 + $0x1] sm:$0x1] %vm707_vm1, %v713_v15  ;;  %v712_v17 = vadd.f32 %v710_v14, %v693_v16 }
 0x428   :  { %715 = vst.msk [vmem:[%s1167_s11] sm:$0x1] %vm707_vm1, %v712_v17 }

</bundles_post_ra>
